<compile_context>
chip_gen: v5e
topology: v5e:2x2
jax: 0.10.0
libtpu: 0.0.40
codegen_flags: <defaults>
</compile_context>

<pallas_src>
import functools

import jax
import jax.numpy as jnp
from jax.experimental import pallas as pl
from jax.experimental.pallas import tpu as pltpu

_LANE = 128


def _round_up(x, m):
    return ((x + m - 1) // m) * m


def _focal_loss_kernel(pred_ref, true_ref, psum_ref, *, gamma, alpha, tile_r,
                       num_tiles, last_valid, needs_mask):
    x = pred_ref[...].astype(jnp.float32)
    y = true_ref[...].astype(jnp.float32)

    # e = exp(-|x|) is reused by both the BCE term and the sigmoid (1 EUP exp).
    e = jnp.exp(-jnp.abs(x))

    # BCEWithLogitsLoss(reduction='none'), numerically stable form:
    #   max(x, 0) - x*y + log1p(exp(-|x|))            (1 EUP log)
    bce = jnp.maximum(x, 0.0) - x * y + jnp.log1p(e)

    # sigmoid(x) from the same e:  x>=0: p = 1/(1+e), 1-p = e/(1+e);  x<0: swap.
    denom = 1.0 + e
    r = pl.reciprocal(denom, approx=True)   # 1 EUP recip
    r = r * (2.0 - denom * r)               # single Newton step -> ~f32 precision
    er = e * r
    p = jnp.where(x >= 0.0, r, er)           # sigmoid(x)
    q = jnp.where(x >= 0.0, er, r)           # 1 - sigmoid(x), exact via same selects

    # 1 - p_t = y*(1-p) + (1-y)*p = p + y*(q - p); clamp tiny negatives (NaN guard).
    one_m_pt = jnp.maximum(p + y * (q - p), 0.0)
    # alpha_factor = y*alpha + (1-y)*(1-alpha), fma-friendly form.
    alpha_factor = (1.0 - alpha) + y * (2.0 * alpha - 1.0)

    # (1 - p_t) ** gamma; exact cheap forms for common gammas (default 1.5 -> sqrt).
    if gamma == 1.5:
        mod = one_m_pt * jnp.sqrt(one_m_pt)   # 1 EUP
    elif gamma == 2.0:
        mod = one_m_pt * one_m_pt
    elif gamma == 1.0:
        mod = one_m_pt
    elif gamma == 0.0:
        mod = jnp.ones_like(one_m_pt)
    else:
        mod = jnp.power(one_m_pt, gamma)

    loss = bce * (alpha_factor * mod)

    def fold(v):
        # (tile_r, 128) -> (8, 128): adds of whole native (8,128) tiles, pure VPU,
        # lane+sublane-dense unmasked store.
        return v.reshape(tile_r // 8, 8, _LANE).sum(axis=0)

    if not needs_mask:
        psum_ref[...] = fold(loss)
    else:
        last = num_tiles - 1

        @pl.when(pl.program_id(0) != last)
        def _():
            psum_ref[...] = fold(loss)

        @pl.when(pl.program_id(0) == last)
        def _():
            # Tile-local flat index (< tile_r*128, no int32 overflow risk); zeroes
            # both the lane-pad elements and the Pallas boundary-block garbage.
            idx = (jax.lax.broadcasted_iota(jnp.int32, loss.shape, 0) * _LANE
                   + jax.lax.broadcasted_iota(jnp.int32, loss.shape, 1))
            psum_ref[...] = fold(jnp.where(idx < last_valid, loss, 0.0))


def focal_loss(pred, true, gamma=1.5, alpha=0.25, reduction="mean"):
    """Focal loss over BCE-with-logits. pred/true: same shape. Returns a scalar."""
    assert pred.shape == true.shape
    total = pred.size

    rows = pl.cdiv(total, _LANE)

    # Tile selection: up to 2048 rows (~1 MiB/input/buffer) to amortize per-step
    # overhead; keep >= 2 tiles when there is enough work (v7x megacore); multiple
    # of 16 so bf16 inputs also tile natively.
    if rows <= 256:
        tile_r = _round_up(rows, 16)
    else:
        tile_r = min(2048, _round_up(pl.cdiv(rows, 2), 16))
    num_tiles = pl.cdiv(rows, tile_r)
    tile_elems = tile_r * _LANE
    last_valid = total - (num_tiles - 1) * tile_elems
    needs_mask = last_valid != tile_elems

    pred_flat = jnp.ravel(pred)
    true_flat = jnp.ravel(true)
    lane_pad = rows * _LANE - total
    if lane_pad:
        # Only pay a pad copy when total isn't lane-aligned; row-dim raggedness is
        # handled by Pallas boundary blocks + the last-tile mask (no pad needed).
        pred_flat = jnp.pad(pred_flat, (0, lane_pad))
        true_flat = jnp.pad(true_flat, (0, lane_pad))
    pred2d = pred_flat.reshape(rows, _LANE)
    true2d = true_flat.reshape(rows, _LANE)

    kernel = functools.partial(
        _focal_loss_kernel,
        gamma=float(gamma),
        alpha=float(alpha),
        tile_r=tile_r,
        num_tiles=num_tiles,
        last_valid=last_valid,
        needs_mask=needs_mask,
    )

    in_bytes = pred2d.dtype.itemsize + true2d.dtype.itemsize
    cost = pl.CostEstimate(
        flops=18 * rows * _LANE,
        transcendentals=4 * rows * _LANE,
        bytes_accessed=rows * _LANE * in_bytes + num_tiles * 8 * _LANE * 4,
    )

    partials = pl.pallas_call(
        kernel,
        out_shape=jax.ShapeDtypeStruct((num_tiles * 8, _LANE), jnp.float32),
        grid_spec=pltpu.PrefetchScalarGridSpec(
            num_scalar_prefetch=0,
            grid=(num_tiles,),
            in_specs=[
                pl.BlockSpec((tile_r, _LANE), lambda i: (i, 0)),
                pl.BlockSpec((tile_r, _LANE), lambda i: (i, 0)),
            ],
            out_specs=pl.BlockSpec((8, _LANE), lambda i: (i, 0)),
        ),
        compiler_params=pltpu.CompilerParams(
            dimension_semantics=("parallel",),   # per-tile outputs -> megacore-friendly
            vmem_limit_bytes=32 * 1024 * 1024,   # ~4-5 MiB footprint; safe on v7x too
        ),
        cost_estimate=cost,
    )(pred2d, true2d)

    total_sum = jnp.sum(partials)
    if reduction == "mean":
        return total_sum * (1.0 / float(total))
    elif reduction == "sum":
        return total_sum
    else:
        # TODO(synk): reduction='none' (full per-element loss output) not implemented.
        raise NotImplementedError("only 'mean' and 'sum' reductions are supported")


def _focal_loss_ref(pred, true, gamma=1.5, alpha=0.25):
    x = pred.astype(jnp.float32)
    y = true.astype(jnp.float32)
    bce = jnp.maximum(x, 0.0) - x * y + jnp.log1p(jnp.exp(-jnp.abs(x)))
    p = jax.nn.sigmoid(x)
    p_t = y * p + (1.0 - y) * (1.0 - p)
    af = y * alpha + (1.0 - y) * (1.0 - alpha)
    mf = jnp.power(1.0 - p_t, gamma)
    return jnp.mean(bce * af * mf)


if __name__ == "__main__":
    key = jax.random.PRNGKey(0)
    k1, k2, k3, k4 = jax.random.split(key, 4)

    # Main check: NCHW shape as PyTorch would feed the loss (lane-aligned path).
    B, C, H, W = 2, 4, 16, 16
    pred = jax.random.normal(k1, (B, C, H, W), dtype=jnp.float32) * 2.0
    true = (jax.random.uniform(k2, (B, C, H, W)) > 0.7).astype(jnp.float32)

    out = focal_loss(pred, true, gamma=1.5, alpha=0.25)
    out = jax.block_until_ready(out)
    ref = _focal_loss_ref(pred, true, gamma=1.5, alpha=0.25)
    assert jnp.allclose(out, ref, rtol=1e-5, atol=1e-6), (out, ref)

    # Secondary check: non-lane-aligned size exercises the last-tile mask path.
    pred2 = jax.random.normal(k3, (3, 5, 7, 11), dtype=jnp.float32) * 2.0
    true2 = (jax.random.uniform(k4, (3, 5, 7, 11)) > 0.5).astype(jnp.float32)
    out2 = jax.block_until_ready(focal_loss(pred2, true2, gamma=1.5, alpha=0.25))
    ref2 = _focal_loss_ref(pred2, true2, gamma=1.5, alpha=0.25)
    assert jnp.allclose(out2, ref2, rtol=1e-5, atol=1e-6), (out2, ref2)

    print("KERNEL_OK")
</pallas_src>

<mosaic_0001>
module attributes {stable_mosaic.version = 11 : i64} {
  func.func @_focal_loss_kernel(%arg0: i32, %arg1: memref<16x128xf32, #tpu.memory_space<vmem>>, %arg2: memref<16x128xf32, #tpu.memory_space<vmem>>, %arg3: memref<8x128xf32, #tpu.memory_space<vmem>>) attributes {dimension_semantics = [#tpu.dimension_semantics<parallel>], iteration_bounds = array<i64: 1>, scalar_prefetch = 0 : i64, scratch_operands = 0 : i64, tpu.core_type = #tpu.core_type<tc>, window_params = [{transform_indices = @transform_0, window_bounds = array<i64: 16, 128>}, {transform_indices = @transform_1, window_bounds = array<i64: 16, 128>}, {transform_indices = @transform_2, window_bounds = array<i64: 8, 128>}]} {
    %c0 = arith.constant 0 : index
    %c0_0 = arith.constant 0 : index
    %0 = vector.load %arg1[%c0, %c0_0] : memref<16x128xf32, #tpu.memory_space<vmem>>, vector<16x128xf32>
    %c0_1 = arith.constant 0 : index
    %c0_2 = arith.constant 0 : index
    %1 = vector.load %arg2[%c0_1, %c0_2] : memref<16x128xf32, #tpu.memory_space<vmem>>, vector<16x128xf32>
    %2 = math.absf %0 : vector<16x128xf32>
    %cst = arith.constant 0.000000e+00 : f32
    %3 = vector.broadcast %cst : f32 to vector<16x128xf32>
    %4 = arith.subf %3, %2 : vector<16x128xf32>
    %5 = math.exp %4 : vector<16x128xf32>
    %cst_3 = arith.constant 0.000000e+00 : f32
    %6 = vector.broadcast %cst_3 : f32 to vector<16x128xf32>
    %7 = arith.maximumf %0, %6 : vector<16x128xf32>
    %8 = arith.mulf %0, %1 : vector<16x128xf32>
    %9 = arith.subf %7, %8 : vector<16x128xf32>
    %10 = math.log1p %5 : vector<16x128xf32>
    %11 = arith.addf %9, %10 : vector<16x128xf32>
    %cst_4 = arith.constant 1.000000e+00 : f32
    %12 = vector.broadcast %cst_4 : f32 to vector<16x128xf32>
    %13 = arith.addf %12, %5 : vector<16x128xf32>
    %14 = tpu.reciprocal %13 {approx = true} : vector<16x128xf32> -> vector<16x128xf32>
    %15 = arith.mulf %13, %14 : vector<16x128xf32>
    %cst_5 = arith.constant 2.000000e+00 : f32
    %16 = vector.broadcast %cst_5 : f32 to vector<16x128xf32>
    %17 = arith.subf %16, %15 : vector<16x128xf32>
    %18 = arith.mulf %14, %17 : vector<16x128xf32>
    %19 = arith.mulf %5, %18 : vector<16x128xf32>
    %cst_6 = arith.constant 0.000000e+00 : f32
    %20 = vector.broadcast %cst_6 : f32 to vector<16x128xf32>
    %21 = arith.cmpf oge, %0, %20 : vector<16x128xf32>
    %22 = arith.select %21, %18, %19 : vector<16x128xi1>, vector<16x128xf32>
    %cst_7 = arith.constant 0.000000e+00 : f32
    %23 = vector.broadcast %cst_7 : f32 to vector<16x128xf32>
    %24 = arith.cmpf oge, %0, %23 : vector<16x128xf32>
    %25 = arith.select %24, %19, %18 : vector<16x128xi1>, vector<16x128xf32>
    %26 = arith.subf %25, %22 : vector<16x128xf32>
    %27 = arith.mulf %1, %26 : vector<16x128xf32>
    %28 = arith.addf %22, %27 : vector<16x128xf32>
    %cst_8 = arith.constant 0.000000e+00 : f32
    %29 = vector.broadcast %cst_8 : f32 to vector<16x128xf32>
    %30 = arith.maximumf %28, %29 : vector<16x128xf32>
    %cst_9 = arith.constant -5.000000e-01 : f32
    %31 = vector.broadcast %cst_9 : f32 to vector<16x128xf32>
    %32 = arith.mulf %1, %31 : vector<16x128xf32>
    %cst_10 = arith.constant 7.500000e-01 : f32
    %33 = vector.broadcast %cst_10 : f32 to vector<16x128xf32>
    %34 = arith.addf %33, %32 : vector<16x128xf32>
    %35 = math.sqrt %30 : vector<16x128xf32>
    %36 = arith.mulf %30, %35 : vector<16x128xf32>
    %37 = arith.mulf %34, %36 : vector<16x128xf32>
    %38 = arith.mulf %11, %37 : vector<16x128xf32>
    %39 = vector.shape_cast %38 : vector<16x128xf32> to vector<2x8x128xf32>
    %cst_11 = arith.constant dense<0.000000e+00> : vector<8x128xf32>
    %40 = vector.multi_reduction <add>, %39, %cst_11 [0] : vector<2x8x128xf32> to vector<8x128xf32>
    %c0_12 = arith.constant 0 : index
    %c0_13 = arith.constant 0 : index
    %41 = vector.load %arg3[%c0_12, %c0_13] : memref<8x128xf32, #tpu.memory_space<vmem>>, vector<8x128xf32>
    tpu.vector_store %arg3[%c0_12, %c0_13], %40 {strides = array<i32>} : memref<8x128xf32, #tpu.memory_space<vmem>>, vector<8x128xf32>,
    return
  }
  func.func @transform_0(%arg0: i32) -> (i32, i32) {
    %c0_i32 = arith.constant 0 : i32
    %c0_i32_0 = arith.constant 0 : i32
    return %arg0, %c0_i32 : i32, i32
  }
  func.func @transform_1(%arg0: i32) -> (i32, i32) {
    %c0_i32 = arith.constant 0 : i32
    %c0_i32_0 = arith.constant 0 : i32
    return %arg0, %c0_i32 : i32, i32
  }
  func.func @transform_2(%arg0: i32) -> (i32, i32) {
    %c0_i32 = arith.constant 0 : i32
    %c0_i32_0 = arith.constant 0 : i32
    return %arg0, %c0_i32 : i32, i32
  }
}

</mosaic_0001>

<bundles_post_ra>
// kernel: tpu_custom_call.1
= control target key start
LH: loop header
LB: loop body
LE: loop exit
PB: predicated region body
PF: predicated region fallthrough
CT: control target
= control target key end

     0   :  { %7 = vsyncpa [#allocation3], 0  ;;  %s328_s0 = inlined_call_operand.hbm [shape: f32[16,128], index: 0, kind: input, shape index: {}]   ;;  %s329_s1 = inlined_call_operand.hbm [shape: f32[16,128], index: 1, kind: input, shape index: {}]   ;;  %s330_s2 = inlined_call_operand.hbm [shape: f32[8,128], index: 2, kind: output, shape index: {}]  }
   0x1   :  { %8 = vsyncpa [#allocation6], 0 }
   0x2   :  { %9 = vsyncpa [#allocation4], 0  ;;  %s14_s11 = sshll.u32 %s328_s0, 4  ;;  %s261_s12 = smov [#allocation2]   ;;  %s15_s11 = int_to_ptr.hbm [resolvable:$true] %s14_s11 }
   0x3   :  { %s16_s13 = sshll.u32 %s261_s12, 4  ;;  %s27_s16 = sshll.u32 %s329_s1, 4  ;;  %s17_s13 = int_to_ptr.vmem [resolvable:$true] %s16_s13  ;;  %s28_s16 = int_to_ptr.hbm [resolvable:$true] %s27_s16 }
   0x4   :  { %s262_s17 = smov 128   ;;  %s263_s18 = smov 8  }
   0x5   :  { %22 = dma.hbm_to_vmem [thread:$0]  %s15_s11, 256, %s17_s13, [#allocation3], %s262_s17, %s262_s17, %s263_s18  }
   0x6   :  { %s264_s19 = smov [#allocation5]  }
   0x7   :  { %s29_s20 = sshll.u32 %s264_s19, 4  ;;  %s30_s20 = int_to_ptr.vmem [resolvable:$true] %s29_s20 }
   0x8   :  { %35 = dma.hbm_to_vmem [thread:$0]  %s28_s16, 256, %s30_s20, [#allocation6], %s262_s17, %s262_s17, %s263_s18  }
   0x9   :  { %255 = dma.done.wait [#allocation3], 256  }
   0xa   :  { %256 = vsyncadd [#allocation3], 4294967040 }
   0xb   :  { %257 = dma.done.wait [#allocation6], 256  }
   0xc   :  { %258 = vsyncadd [#allocation6], 4294967040  ;;  %v287_v0 = vld [vmem:[#allocation2] sm:$0xff]  ;;  %v289_v1 = vld [vmem:[#allocation2 + $0x8] sm:$0xff]  ;;  %s265_s0 = smov [#allocation7]   ;;  %s151_s23 = sshll.u32 %s330_s2, 4  ;;  %s152_s23 = int_to_ptr.hbm [resolvable:$true] %s151_s23 }
   0xd   :  { %v48_v2 = vand.u32 2147483647, %v287_v0  ;;  %v49_v3 = vand.u32 2147483647, %v289_v1  ;;  %vm94_vm0 = vcmp.ge.f32.partialorder %v287_v0, 0.0  ;;  %vm95_vm1 = vcmp.ge.f32.partialorder %v289_v1, 0.0 }
   0xe   :  { %v46_v22 = vld [vmem:[#allocation5] sm:$0xff]  ;;  %v47_v25 = vld [vmem:[#allocation5 + $0x8] sm:$0xff]  ;;  %v56_v42 = vmax.f32 %v287_v0, 0.0  ;;  %v57_v52 = vmax.f32 %v289_v1, 0.0  ;;  %s149_s1 = sshll.u32 %s265_s0, 4  ;;  %s150_s1 = int_to_ptr.vmem [resolvable:$true] %s149_s1 }
   0xf   :  { %v50_v4 = vsub.f32 0.0, %v48_v2  ;;  %v51_v5 = vsub.f32 0.0, %v49_v3  ;;  %v58_v43 = vmul.f32 %v46_v22, %v287_v0  ;;  %v59_v55 = vmul.f32 %v47_v25, %v289_v1 }
  0x10   :  { %v108_v57 = vmul.f32 -0.5, %v46_v22  ;;  %v109_v61 = vmul.f32 -0.5, %v47_v25 }
  0x11   :  { %v52_v6 = vmul.f32 1.442695, %v50_v4  ;;  %v54_v7 = vmul.f32 1.442695, %v51_v5  ;;  %v60_v56 = vsub.f32 %v56_v42, %v58_v43 }
  0x13   :  { %167 = vpow2.f32 %v52_v6 }
  0x14   :  { %169 = vpow2.f32 %v54_v7 }
  0x19   :  { %v293_v8 = vpop.eup %167 }
  0x1a   :  { %v295_v9 = vpop.eup %169  ;;  %v62_v10 = vadd.f32 1.0, %v293_v8  ;;  %v65_v37 = vmul.f32 -0.5, %v293_v8  ;;  %v68_v48 = vand.u32 2147483647, %v293_v8 }
  0x1b   :  { %v71_v11 = vadd.f32 1.0, %v295_v9  ;;  %v74_v39 = vmul.f32 -0.5, %v295_v9  ;;  %v77_v53 = vand.u32 2147483647, %v295_v9 }
  0x1c   :  { %171 = vrcp.f32 %v62_v10  ;;  %v66_v45 = vadd.f32 1.0, %v65_v37  ;;  %vm312_vm2 = vcmp.lt.f32.partialorder %v68_v48, 0.0004427343 }
  0x1d   :  { %173 = vrcp.f32 %v71_v11  ;;  %v75_v49 = vadd.f32 1.0, %v74_v39  ;;  %vm317_vm3 = vcmp.lt.f32.partialorder %v77_v53, 0.0004427343 }
  0x1e   :  { %v67_v60 = vmul.f32 %v293_v8, %v66_v45 }
  0x1f   :  { %v76_v2 = vmul.f32 %v295_v9, %v75_v49 }
  0x22   :  { %v172_v12 = vpop.eup %171 }
  0x23   :  { %v174_v13 = vpop.eup %173  ;;  %v86_v14 = vmul.f32 %v172_v12, %v62_v10 }
  0x24   :  { %v87_v15 = vmul.f32 %v174_v13, %v71_v11 }
  0x25   :  { %v88_v16 = vsub.f32 2.0, %v86_v14  ;;  %v111_v14 = vadd.f32 0.75, %v109_v61 }
  0x26   :  { %v89_v17 = vsub.f32 2.0, %v87_v15 }
  0x27   :  { %v90_v18 = vmul.f32 %v172_v12, %v88_v16  ;;  %v110_v12 = vadd.f32 0.75, %v108_v57 }
  0x28   :  { %v91_v19 = vmul.f32 %v174_v13, %v89_v17 }
  0x29   :  { %v92_v20 = vmul.f32 %v293_v8, %v90_v18  ;;  %v61_v8 = vsub.f32 %v57_v52, %v59_v55 }
  0x2a   :  { %v93_v21 = vmul.f32 %v295_v9, %v91_v19 }
  0x2b   :  { %v96_v23 = vsel %vm94_vm0, %v90_v18, %v92_v20  ;;  %v98_v24 = vsel %vm94_vm0, %v92_v20, %v90_v18 }
  0x2c   :  { %v97_v26 = vsel %vm95_vm1, %v91_v19, %v93_v21  ;;  %v99_v27 = vsel %vm95_vm1, %v93_v21, %v91_v19  ;;  %v100_v28 = vsub.f32 %v98_v24, %v96_v23 }
  0x2d   :  { %v101_v29 = vsub.f32 %v99_v27, %v97_v26 }
  0x2e   :  { %v102_v30 = vmul.f32 %v100_v28, %v46_v22 }
  0x2f   :  { %v103_v31 = vmul.f32 %v101_v29, %v47_v25 }
  0x30   :  { %v104_v32 = vadd.f32 %v102_v30, %v96_v23 }
  0x31   :  { %v105_v33 = vadd.f32 %v103_v31, %v97_v26 }
  0x32   :  { %v106_v34 = vmax.f32 %v104_v32, 0.0 }
  0x33   :  { %v107_v35 = vmax.f32 %v105_v33, 0.0 }
  0x34   :  { %175 = vrsqrt.f32 %v106_v34  ;;  %vm119_vm4 = vcmp.eq.f32.partialorder %v106_v34, inf  ;;  %v122_v1 = vand.u32 2147483648, %v106_v34  ;;  %vm121_vm5 = vcmp.eq.f32.partialorder %v106_v34, 0.0 }
  0x35   :  { %177 = vrsqrt.f32 %v107_v35  ;;  %vm131_vm6 = vcmp.eq.f32.partialorder %v107_v35, inf  ;;  %v134_v7 = vand.u32 2147483648, %v107_v35  ;;  %vm133_vm7 = vcmp.eq.f32.partialorder %v107_v35, 0.0 }
  0x36   :  { %179 = vlog2.f32 %v62_v10 }
  0x37   :  { %181 = vlog2.f32 %v71_v11 }
  0x3a   :  { %v176_v36 = vpop.eup %175 }
  0x3b   :  { %v178_v38 = vpop.eup %177  ;;  %v113_v40 = vmul.f32 %v176_v36, %v106_v34 }
  0x3c   :  { %v125_v41 = vmul.f32 %v178_v38, %v107_v35  ;;  %v180_v47 = vpop.eup %179 }
  0x3d   :  { %v114_v44 = vmul.f32 %v176_v36, %v113_v40  ;;  %v182_v51 = vpop.eup %181  ;;  %v64_v59 = vmul.f32 0.6931472, %v180_v47 }
  0x3e   :  { %v126_v46 = vmul.f32 %v178_v38, %v125_v41  ;;  %v73_v0 = vmul.f32 0.6931472, %v182_v51 }
  0x3f   :  { %v115_v50 = vmul.f32 0.5, %v114_v44  ;;  %v70_v10 = vsel %vm312_vm2, %v67_v60, %v64_v59 }
  0x40   :  { %v127_v54 = vmul.f32 0.5, %v126_v46  ;;  %v79_v9 = vsel %vm317_vm3, %v76_v2, %v73_v0  ;;  %v80_v17 = vadd.f32 %v70_v10, %v60_v56 }
  0x41   :  { %v116_v58 = vsub.f32 1.5, %v115_v50  ;;  %v81_v20 = vadd.f32 %v79_v9, %v61_v8 }
  0x42   :  { %v128_v62 = vsub.f32 1.5, %v127_v54 }
  0x43   :  { %v117_v3 = vmul.f32 %v176_v36, %v116_v58 }
  0x44   :  { %v129_v5 = vmul.f32 %v178_v38, %v128_v62 }
  0x45   :  { %v118_v6 = vmul.f32 %v117_v3, %v106_v34 }
  0x46   :  { %v130_v11 = vmul.f32 %v129_v5, %v107_v35 }
  0x47   :  { %v120_v13 = vsel %vm119_vm4, %v106_v34, %v118_v6 }
  0x48   :  { %v123_v15 = vsel %vm121_vm5, %v122_v1, %v120_v13  ;;  %v132_v16 = vsel %vm131_vm6, %v107_v35, %v130_v11 }
  0x49   :  { %v135_v18 = vsel %vm133_vm7, %v134_v7, %v132_v16  ;;  %v136_v19 = vmul.f32 %v123_v15, %v106_v34 }
  0x4a   :  { %v137_v21 = vmul.f32 %v135_v18, %v107_v35 }
  0x4b   :  { %v138_v22 = vmul.f32 %v136_v19, %v110_v12 }
  0x4c   :  { %v139_v23 = vmul.f32 %v137_v21, %v111_v14 }
  0x4d   :  { %v140_v24 = vmul.f32 %v138_v22, %v80_v17 }
  0x4e   :  { %v141_v25 = vmul.f32 %v139_v23, %v81_v20 }
  0x50   :  { %v142_v26 = vadd.f32 %v141_v25, %v140_v24 }
  0x52   :  { %143 = vst [vmem:[#allocation7] sm:$0xff] %v142_v26 }
  0x53   :  { %154 = dma.vmem_to_hbm [thread:$0]  %s150_s1, 128, %s152_s23, [#allocation4]  }
  0x54   :  { %259 = dma.done.wait [#allocation4], 128  }
  0x55   :  { %260 = vsyncadd [#allocation4], 4294967168 }
  0x56   :  { %159 = vsyncpa [#allocation3], 1 }
  0x57   :  { %160 = vsyncpa [#allocation6], 1 }
  0x58   :  { %161 = vsyncpa [#allocation4], 1 }

</bundles_post_ra>
